<compile_context>
chip_gen: v7x
topology: tpu7x:2x2x1
jax: 0.10.0
libtpu: 0.0.40
codegen_flags: <defaults>
</compile_context>

<pallas_src>
import functools

import jax
import jax.numpy as jnp
from jax.experimental import pallas as pl
from jax.experimental.pallas import tpu as pltpu


def _independent_dropout_kernel(u_ref, *io_refs, n_items, keep_prob):
    """u_ref: (n_items, TILE_R, 1) uniforms; io_refs = n x_refs then n o_refs,
    each (TILE_R, C)."""
    x_refs = io_refs[:n_items]
    o_refs = io_refs[n_items:]

    # Per-row keep decisions and the joint rescale factor (all shape (TILE_R, 1)).
    keeps = [u_ref[i] < keep_prob for i in range(n_items)]
    total = keeps[0].astype(jnp.float32)
    for i in range(1, n_items):
        total = total + keeps[i].astype(jnp.float32)
    scale = float(n_items) / jnp.maximum(total, 1.0)

    for i in range(n_items):
        mask = jnp.where(keeps[i], scale, 0.0).astype(x_refs[i].dtype)  # (TILE_R, 1)
        # Lane-broadcast of the per-row mask over the channel axis.
        o_refs[i][...] = x_refs[i][...] * mask


def _sample_uniforms(seed, n_items, rows):
    """Per-(tensor, position) uniforms in [0, 1), shape (n_items, rows, 1)."""
    key = jax.random.PRNGKey(seed)
    u = jax.random.uniform(key, (n_items, rows), dtype=jnp.float32)
    return u.reshape(n_items, rows, 1)


def independent_dropout(*items, p=0.5, seed=0, training=True, tile_rows=512):
    """Pallas equivalent of IndependentDropout.forward(*items).

    Each item must be a 3D array (B, T, C); all items share the same shape.
    Returns a list of arrays with the same shapes/dtypes as the inputs.
    """
    items = list(items)
    if (not training) or p == 0.0 or len(items) == 0:
        return items

    n = len(items)
    shape = items[0].shape
    if any(x.shape != shape for x in items):
        raise ValueError("all inputs must share the same shape")
    if len(shape) != 3:
        raise ValueError(f"expected 3D inputs (B, T, C), got shape {shape}")

    B, T, C = shape
    rows = B * T
    flat = [x.reshape(rows, C) for x in items]

    # Per-position uniforms: tiny (no C axis) relative to the (rows, C) data.
    u = _sample_uniforms(seed, n, rows)

    tr = rows if rows <= tile_rows else tile_rows
    grid = (pl.cdiv(rows, tr),)

    in_specs = [pl.BlockSpec((n, tr, 1), lambda r: (0, r, 0))]
    in_specs += [pl.BlockSpec((tr, C), lambda r: (r, 0)) for _ in range(n)]
    out_specs = [pl.BlockSpec((tr, C), lambda r: (r, 0)) for _ in range(n)]
    out_shape = [jax.ShapeDtypeStruct((rows, C), x.dtype) for x in items]

    kernel = functools.partial(
        _independent_dropout_kernel, n_items=n, keep_prob=1.0 - float(p))

    outs = pl.pallas_call(
        kernel,
        grid=grid,
        in_specs=in_specs,
        out_specs=out_specs,
        out_shape=out_shape,
        compiler_params=pltpu.CompilerParams(
            dimension_semantics=("parallel",),
            vmem_limit_bytes=32 * 1024 * 1024,
        ),
    )(u, *flat)

    return [o.reshape(B, T, C) for o in outs]


if __name__ == "__main__":
    root = jax.random.PRNGKey(0)
    kx, ky = jax.random.split(root)

    B, T, C = 2, 8, 32
    x = jax.random.normal(kx, (B, T, C), dtype=jnp.float32)
    y = jax.random.normal(ky, (B, T, C), dtype=jnp.float32)

    p = 0.5
    seed = 42
    ox, oy = independent_dropout(x, y, p=p, seed=seed, training=True)
    ox = jax.block_until_ready(ox)
    oy = jax.block_until_ready(oy)

    # Pure-JAX reference computed from the same uniforms.
    u = _sample_uniforms(seed, 2, B * T).reshape(2, B, T)
    keep = (u < (1.0 - p)).astype(jnp.float32)
    total = keep.sum(axis=0)
    scale = 2.0 / jnp.maximum(total, 1.0)
    ref_x = x * (keep[0] * scale)[..., None]
    ref_y = y * (keep[1] * scale)[..., None]
    assert bool(jnp.allclose(ox, ref_x, rtol=1e-6, atol=1e-6))
    assert bool(jnp.allclose(oy, ref_y, rtol=1e-6, atol=1e-6))

    # Locked-over-channels: each (b, t) row of an output is either all-zero or a
    # uniform rescale of the input row.
    row_zero = (ox == 0.0).all(axis=-1) | (jnp.abs(ox / jnp.where(x == 0, 1, x))
                                           .std(axis=-1) < 1e-5)
    assert bool(row_zero.all())

    # Eval mode / p == 0 are identity.
    ex, ey = independent_dropout(x, y, p=p, training=False)
    assert bool(jnp.array_equal(ex, x)) and bool(jnp.array_equal(ey, y))
    zx, zy = independent_dropout(x, y, p=0.0, training=True)
    assert bool(jnp.array_equal(zx, x)) and bool(jnp.array_equal(zy, y))

    print("KERNEL_OK")
</pallas_src>

<mosaic_0001>
module attributes {stable_mosaic.version = 11 : i64} {
  func.func @_independent_dropout_kernel(%arg0: i32, %arg1: memref<2x16x1xf32, #tpu.memory_space<vmem>>, %arg2: memref<16x32xf32, #tpu.memory_space<vmem>>, %arg3: memref<16x32xf32, #tpu.memory_space<vmem>>, %arg4: memref<16x32xf32, #tpu.memory_space<vmem>>, %arg5: memref<16x32xf32, #tpu.memory_space<vmem>>) attributes {dimension_semantics = [#tpu.dimension_semantics<parallel>], iteration_bounds = array<i64: 1>, scalar_prefetch = 0 : i64, scratch_operands = 0 : i64, tpu.core_type = #tpu.core_type<tc>, window_params = [{transform_indices = @transform_0, window_bounds = array<i64: 2, 16, 1>}, {transform_indices = @transform_1, window_bounds = array<i64: 16, 32>}, {transform_indices = @transform_2, window_bounds = array<i64: 16, 32>}, {transform_indices = @transform_3, window_bounds = array<i64: 16, 32>}, {transform_indices = @transform_4, window_bounds = array<i64: 16, 32>}]} {
    %c0 = arith.constant 0 : index
    %c0_0 = arith.constant 0 : index
    %c0_1 = arith.constant 0 : index
    %0 = vector.load %arg1[%c0, %c0_0, %c0_1] : memref<2x16x1xf32, #tpu.memory_space<vmem>>, vector<1x16x1xf32>
    %1 = vector.shape_cast %0 : vector<1x16x1xf32> to vector<16x1xf32>
    %cst = arith.constant 5.000000e-01 : f32
    %2 = vector.broadcast %cst : f32 to vector<16x1xf32>
    %3 = arith.cmpf olt, %1, %2 : vector<16x1xf32>
    %c1 = arith.constant 1 : index
    %c0_2 = arith.constant 0 : index
    %c0_3 = arith.constant 0 : index
    %4 = vector.load %arg1[%c1, %c0_2, %c0_3] : memref<2x16x1xf32, #tpu.memory_space<vmem>>, vector<1x16x1xf32>
    %5 = vector.shape_cast %4 : vector<1x16x1xf32> to vector<16x1xf32>
    %cst_4 = arith.constant 5.000000e-01 : f32
    %6 = vector.broadcast %cst_4 : f32 to vector<16x1xf32>
    %7 = arith.cmpf olt, %5, %6 : vector<16x1xf32>
    %8 = arith.extui %3 : vector<16x1xi1> to vector<16x1xi32>
    %9 = arith.sitofp %8 : vector<16x1xi32> to vector<16x1xf32>
    %10 = arith.extui %7 : vector<16x1xi1> to vector<16x1xi32>
    %11 = arith.sitofp %10 : vector<16x1xi32> to vector<16x1xf32>
    %12 = arith.addf %9, %11 : vector<16x1xf32>
    %cst_5 = arith.constant 1.000000e+00 : f32
    %13 = vector.broadcast %cst_5 : f32 to vector<16x1xf32>
    %14 = arith.maximumf %12, %13 : vector<16x1xf32>
    %cst_6 = arith.constant 2.000000e+00 : f32
    %15 = vector.broadcast %cst_6 : f32 to vector<16x1xf32>
    %16 = arith.divf %15, %14 : vector<16x1xf32>
    %cst_7 = arith.constant 0.000000e+00 : f32
    %17 = vector.broadcast %cst_7 : f32 to vector<16x1xf32>
    %18 = arith.select %3, %16, %17 : vector<16x1xi1>, vector<16x1xf32>
    %c0_8 = arith.constant 0 : index
    %c0_9 = arith.constant 0 : index
    %19 = vector.load %arg2[%c0_8, %c0_9] : memref<16x32xf32, #tpu.memory_space<vmem>>, vector<16x32xf32>
    %20 = vector.broadcast %18 : vector<16x1xf32> to vector<16x32xf32>
    %21 = arith.mulf %19, %20 : vector<16x32xf32>
    %c0_10 = arith.constant 0 : index
    %c0_11 = arith.constant 0 : index
    %22 = vector.load %arg4[%c0_10, %c0_11] : memref<16x32xf32, #tpu.memory_space<vmem>>, vector<16x32xf32>
    tpu.vector_store %arg4[%c0_10, %c0_11], %21 {strides = array<i32>} : memref<16x32xf32, #tpu.memory_space<vmem>>, vector<16x32xf32>,
    %cst_12 = arith.constant 0.000000e+00 : f32
    %23 = vector.broadcast %cst_12 : f32 to vector<16x1xf32>
    %24 = arith.select %7, %16, %23 : vector<16x1xi1>, vector<16x1xf32>
    %c0_13 = arith.constant 0 : index
    %c0_14 = arith.constant 0 : index
    %25 = vector.load %arg3[%c0_13, %c0_14] : memref<16x32xf32, #tpu.memory_space<vmem>>, vector<16x32xf32>
    %26 = vector.broadcast %24 : vector<16x1xf32> to vector<16x32xf32>
    %27 = arith.mulf %25, %26 : vector<16x32xf32>
    %c0_15 = arith.constant 0 : index
    %c0_16 = arith.constant 0 : index
    %28 = vector.load %arg5[%c0_15, %c0_16] : memref<16x32xf32, #tpu.memory_space<vmem>>, vector<16x32xf32>
    tpu.vector_store %arg5[%c0_15, %c0_16], %27 {strides = array<i32>} : memref<16x32xf32, #tpu.memory_space<vmem>>, vector<16x32xf32>,
    return
  }
  func.func @transform_0(%arg0: i32) -> (i32, i32, i32) {
    %c0_i32 = arith.constant 0 : i32
    %c0_i32_0 = arith.constant 0 : i32
    %c0_i32_1 = arith.constant 0 : i32
    return %c0_i32, %arg0, %c0_i32_0 : i32, i32, i32
  }
  func.func @transform_1(%arg0: i32) -> (i32, i32) {
    %c0_i32 = arith.constant 0 : i32
    %c0_i32_0 = arith.constant 0 : i32
    return %arg0, %c0_i32 : i32, i32
  }
  func.func @transform_2(%arg0: i32) -> (i32, i32) {
    %c0_i32 = arith.constant 0 : i32
    %c0_i32_0 = arith.constant 0 : i32
    return %arg0, %c0_i32 : i32, i32
  }
  func.func @transform_3(%arg0: i32) -> (i32, i32) {
    %c0_i32 = arith.constant 0 : i32
    %c0_i32_0 = arith.constant 0 : i32
    return %arg0, %c0_i32 : i32, i32
  }
  func.func @transform_4(%arg0: i32) -> (i32, i32) {
    %c0_i32 = arith.constant 0 : i32
    %c0_i32_0 = arith.constant 0 : i32
    return %arg0, %c0_i32 : i32, i32
  }
}

</mosaic_0001>

<bundles_post_ra>
// kernel: tpu_custom_call.1
= control target key start
LH: loop header
LB: loop body
LE: loop exit
PB: predicated region body
PF: predicated region fallthrough
CT: control target
= control target key end

     0   :  { %10 = vsyncpa [#allocation3], 0  ;;  %v178_v3 = vmov 0   ;;  %v179_v5 = vmov 0.0   ;;  %s276_s0 = inlined_call_operand.vmem [shape: f32[2,16,1], index: 0, kind: input, shape index: {}]   ;;  %s277_s1 = inlined_call_operand.vmem [shape: f32[16,32], index: 1, kind: input, shape index: {}]   ;;  %s278_s2 = inlined_call_operand.vmem [shape: f32[16,32], index: 2, kind: input, shape index: {}]   ;;  %s279_s3 = inlined_call_operand.hbm [shape: f32[16,32], index: 3, kind: output, shape index: {0}]   ;;  %s280_s4 = inlined_call_operand.hbm [shape: f32[16,32], index: 4, kind: output, shape index: {1}]  }
   0x1   :  { %v18_v0 = vld [vmem:[%s276_s0] sm:$0xff]  ;;  %v112_v1 = vld [vmem:[%s276_s0 + $0x10] sm:$0xff]  ;;  %v19_v2 = vld [vmem:[%s276_s0 + $0x8] sm:$0xff]  ;;  %125 = vset.pattern.permute.xlu1 %v178_v3  ;;  %124 = vset.pattern.permute.xlu0 %v178_v3 }
   0x2   :  { %vm20_vm0 = vcmp.lt.f32.partialorder %v18_v0, 0.5  ;;  %vm25_vm1 = vcmp.lt.f32.partialorder %v112_v1, 0.5  ;;  %vm21_vm2 = vcmp.lt.f32.partialorder %v19_v2, 0.5  ;;  %v113_v4 = vld [vmem:[%s276_s0 + $0x18] sm:$0xff] }
   0x3   :  { %v114_v6 = vsel %vm20_vm0, 1.0, %v179_v5  ;;  %v116_v7 = vsel %vm25_vm1, 1.0, %v179_v5  ;;  %vm26_vm3 = vcmp.lt.f32.partialorder %v113_v4, 0.5  ;;  %v115_v8 = vsel %vm21_vm2, 1.0, %v179_v5 }
   0x4   :  { %11 = vsyncpa [#allocation5], 0  ;;  %v35_v9 = vadd.f32 %v116_v7, %v114_v6  ;;  %v117_v10 = vsel %vm26_vm3, 1.0, %v179_v5  ;;  %v64_v22 = vld [vmem:[%s278_s2] sm:$0xff]  ;;  %vm59_vm4 = vcmask 261120   ;;  %s180_s26 = smov [#allocation2]  }
   0x5   :  { %v36_v11 = vadd.f32 %v117_v10, %v115_v8  ;;  %v45_v23 = vld [vmem:[%s277_s1] sm:$0xff]  ;;  %s85_s27 = sshll.u32 %s180_s26, 4  ;;  %v65_v28 = vld [vmem:[%s278_s2 + $0x8] sm:$0xff]  ;;  %s181_s6 = smov [#allocation4]   ;;  %s86_s27 = int_to_ptr.vmem [resolvable:$true] %s85_s27 }
   0x6   :  { %v37_v12 = vmax.f32 %v35_v9, 1.0  ;;  %v46_v29 = vld [vmem:[%s277_s1 + $0x8] sm:$0xff]  ;;  %s97_s7 = sshll.u32 %s181_s6, 4  ;;  %s130_s2 = scalar_lea.vmem %s86_s27, 256  ;;  %s243_s7 = int_to_ptr.vmem [resolvable:$true] %s97_s7 }
   0x7   :  { %v38_v13 = vmax.f32 %v36_v11, 1.0  ;;  %p131_p0 = scmp.ne.s32.totalorder %s86_s27, %s130_s2  ;;  %p135_p1 = scmp.lt.s32.totalorder %s86_s27, %s86_s27 }
   0x8   :  { %126 = vrcp.f32 %v37_v12  ;;  %p136_p2 = scmp.lt.s32.totalorder %s130_s2, %s130_s2 }
   0x9   :  { %128 = vrcp.f32 %v38_v13 }
   0xa   :  { %p137_p3 = por %p136_p2, %p135_p1 }
   0xc   :  { %p138_p4 = pnand %p137_p3, %p131_p0 }
  0x12   :  { %v127_v14 = vpop.eup %126 }
  0x13   :  { %v129_v15 = vpop.eup %128  ;;  %v40_v16 = vmul.f32 2.0, %v127_v14 }
  0x14   :  { %v42_v17 = vmul.f32 2.0, %v129_v15 }
  0x15   :  { %v62_v18 = vsel %vm25_vm1, %v40_v16, 0.0  ;;  %v43_v19 = vsel %vm20_vm0, %v40_v16, 0.0 }
  0x16   :  { %68 = vperm.xlu1 %125, %v62_v18   ;;  %49 = vperm.xlu0 %124, %v43_v19   ;;  %v63_v20 = vsel %vm26_vm3, %v42_v17, 0.0  ;;  %v44_v21 = vsel %vm21_vm2, %v42_v17, 0.0 }
  0x1a   :  { %73 = vperm.xlu1 %125, %v63_v20   ;;  %54 = vperm.xlu0 %124, %v44_v21  }
  0x95   :  { %v69_v24 = vpop.permute.xlu1 %68  ;;  %v50_v25 = vpop.permute.xlu0 %49 }
  0x96   :  { %v76_v26 = vmul.f32 %v69_v24, %v64_v22  ;;  %v57_v27 = vmul.f32 %v50_v25, %v45_v23 }
  0x98   :  { %78 = vst.msk [vmem:[#allocation4] sm:$0xff] %vm59_vm4, %v76_v26  ;;  %60 = vst.msk [vmem:[#allocation2] sm:$0xff] %vm59_vm4, %v57_v27 }
  0x99   :  { %v74_v30 = vpop.permute.xlu1 %73  ;;  %v55_v31 = vpop.permute.xlu0 %54 }
  0x9a   :  { %v77_v32 = vmul.f32 %v74_v30, %v65_v28  ;;  %v58_v33 = vmul.f32 %v55_v31, %v46_v29 }
  0x9c   :  { %79 = vst.msk [vmem:[#allocation4 + $0x8] sm:$0xff] %vm59_vm4, %v77_v32  ;;  %61 = vst.msk [vmem:[#allocation2 + $0x8] sm:$0xff] %vm59_vm4, %v58_v33 }
  0x9d   :  { %141 = shalt.err (!%p138_p4)
}
  0x9e   :  { %s142_s9 = scalar_lea.hbm %s279_s3, 256 }
  0x9f   :  { %p143_p5 = scmp.ne.s32.totalorder %s279_s3, %s142_s9  ;;  %p146_p6 = scmp.lt.u32.totalorder %s142_s9, %s279_s3 }
  0xa1   :  { %p148_p7 = pnand %p146_p6, %p143_p5 }
  0xa3   :  { %151 = shalt.err (!%p148_p7)
}
  0xa4   :  { %s182_s14 = smov 128   ;;  %s183_s15 = smov 8  }
  0xa5   :  { %91 = dma.vmem_to_hbm [thread:$0]  %s86_s27, 256, %s279_s3, [#allocation3], %s182_s14, %s182_s14, %s183_s15  }
  0xa6   :  { %s152_s18 = scalar_lea.vmem %s243_s7, 256  ;;  %p157_p9 = scmp.lt.s32.totalorder %s243_s7, %s243_s7 }
  0xa7   :  { %p153_p8 = scmp.ne.s32.totalorder %s243_s7, %s152_s18  ;;  %p158_p10 = scmp.lt.s32.totalorder %s152_s18, %s152_s18 }
  0xa9   :  { %p159_p11 = por %p158_p10, %p157_p9 }
  0xab   :  { %p160_p12 = pnand %p159_p11, %p153_p8 }
  0xad   :  { %163 = shalt.err (!%p160_p12)
}
  0xae   :  { %s164_s21 = scalar_lea.hbm %s280_s4, 256 }
  0xaf   :  { %p165_p13 = scmp.ne.s32.totalorder %s280_s4, %s164_s21  ;;  %p168_p0 = scmp.lt.u32.totalorder %s164_s21, %s280_s4 }
  0xb1   :  { %p170_p1 = pnand %p168_p0, %p165_p13 }
  0xb3   :  { %173 = shalt.err (!%p170_p1)
}
  0xb4   :  { %103 = dma.vmem_to_hbm [thread:$0]  %s243_s7, 256, %s280_s4, [#allocation5], %s182_s14, %s182_s14, %s183_s15  }
  0xb5   :  { %174 = dma.done.wait [#allocation3], 256  }
  0xb6   :  { %175 = vsyncadd [#allocation3], 4294967040 }
  0xb7   :  { %176 = dma.done.wait [#allocation5], 256  }
  0xb8   :  { %177 = vsyncadd [#allocation5], 4294967040 }
  0xb9   :  { %110 = vsyncpa [#allocation3], 1 }
  0xba   :  { %111 = vsyncpa [#allocation5], 1 }

</bundles_post_ra>
